<compile_context>
chip_gen: v5e
topology: v5e:2x2
jax: 0.10.0
libtpu: 0.0.40
codegen_flags: <defaults>
</compile_context>

<pallas_src>
import functools
import numpy as np
import jax
import jax.numpy as jnp
from jax.experimental import pallas as pl
from jax.experimental.pallas import tpu as pltpu


def _round_up(n, m):
    return ((n + m - 1) // m) * m


# --------------------------------------------------------------------------- #
# Kernel
# --------------------------------------------------------------------------- #
def _koopman_kernel(nblocks, kd,
                    x_ref, win_ref, bin_ref,
                    w1_ref, b1_ref, w2_ref, b2_ref,
                    wang_ref, bang_ref, csmat_ref, woff_ref, boff_ref,
                    kflat_ref):
    bf16 = jnp.bfloat16

    # --- ResNet MLP: bf16 operands on the MXU, f32 accumulation & f32 elementwise ---
    x = x_ref[...].astype(bf16)
    h = jnp.dot(x, win_ref[...], preferred_element_type=jnp.float32) + bin_ref[...]
    h = jnp.maximum(h, 0.0)
    for i in range(nblocks):  # static unroll, nblocks is small
        y = jnp.dot(h.astype(bf16), w1_ref[i], preferred_element_type=jnp.float32) + b1_ref[i]
        y = jnp.maximum(y, 0.0)
        y = jnp.dot(y.astype(bf16), w2_ref[i], preferred_element_type=jnp.float32) + b2_ref[i]
        h = jnp.maximum(h + y, 0.0)
    hb = h.astype(bf16)

    # --- angles: duplicated angle columns -> [tb, kd]; first half cos, second half sin ---
    theta = jnp.dot(hb, wang_ref[...], preferred_element_type=jnp.float32) + bang_ref[...]
    col = jax.lax.broadcasted_iota(jnp.int32, theta.shape, 1)
    cs = jnp.where(col < kd // 2, jnp.cos(theta), jnp.sin(theta))  # f32 [tb, kd]

    # --- K (flattened, lane-dense padded): one fused rotation scatter + folded off-diag ---
    kflat = (jnp.dot(cs.astype(bf16), csmat_ref[...], preferred_element_type=jnp.float32)
             + jnp.dot(hb, woff_ref[...], preferred_element_type=jnp.float32)
             + boff_ref[...])
    kflat_ref[...] = kflat


# --------------------------------------------------------------------------- #
# Host-side scatter-matrix construction (cached) and weight preprocessing
# --------------------------------------------------------------------------- #
@functools.lru_cache(maxsize=None)
def _scatter_mats(kd):
    """One-hot scatter matrices mapping (cos|sin) and off-diag params to flattened-K columns.

    Columns are padded up to a multiple of 128 so the kernel output is lane-dense.
    """
    kk = kd * kd
    kk_pad = _round_up(kk, 128)
    half = kd // 2
    cs = np.zeros((kd, kk_pad), np.float32)
    for i in range(half):
        cs[i, (2 * i) * kd + (2 * i)] = 1.0               # K[2i, 2i]       =  cos
        cs[i, (2 * i + 1) * kd + (2 * i + 1)] = 1.0       # K[2i+1, 2i+1]   =  cos
        cs[half + i, (2 * i + 1) * kd + (2 * i)] = 1.0    # K[2i+1, 2i]     =  sin
        cs[half + i, (2 * i) * kd + (2 * i + 1)] = -1.0   # K[2i, 2i+1]     = -sin
    mask = np.triu(np.ones((kd, kd), dtype=bool), k=1)
    for i in range(half):
        mask[2 * i, 2 * i + 1] = False
    rows, cols = np.nonzero(mask)  # row-major order == torch.nonzero order
    omat = np.zeros((rows.shape[0], kk_pad), np.float32)
    for j, (r, c) in enumerate(zip(rows, cols)):
        omat[j, r * kd + c] = 1.0
    # TODO(synk): for large koopman_dim these dense one-hot matrices scale O(kd^4);
    #             switch to in-kernel masked writes / streamed scatter in that regime.
    return cs, omat, kk_pad


def _fold_bn(w, b, gamma, beta, mean, var, eps=1e-5):
    """Fold eval-mode BatchNorm1d into the preceding Linear(w, b)."""
    scale = gamma / jnp.sqrt(var + eps)
    return w * scale[None, :], (b - mean) * scale + beta


def init_params(key, params_dim, koopman_dim, layers, hidden=64):
    nblocks = int(sum(layers))
    out_dim = koopman_dim * (koopman_dim - 1) // 2

    def lin(k, fan_in, fan_out):
        kw, kb = jax.random.split(k)
        w = 0.1 * jax.random.normal(kw, (fan_in, fan_out), jnp.float32)
        b = 0.1 * jax.random.normal(kb, (fan_out,), jnp.float32)
        return w, b

    def bn(k, dim):
        k1, k2, k3, k4 = jax.random.split(k, 4)
        gamma = 1.0 + 0.1 * jax.random.normal(k1, (dim,), jnp.float32)
        beta = 0.1 * jax.random.normal(k2, (dim,), jnp.float32)
        mean = 0.1 * jax.random.normal(k3, (dim,), jnp.float32)
        var = 1.0 + 0.05 * jnp.abs(jax.random.normal(k4, (dim,), jnp.float32))
        return gamma, beta, mean, var

    keys = jax.random.split(key, 2 * (1 + 2 * nblocks + 1))
    ki = iter(keys)

    w_in, b_in = lin(next(ki), params_dim, hidden)
    w_in, b_in = _fold_bn(w_in, b_in, *bn(next(ki), hidden))

    w1s, b1s, w2s, b2s = [], [], [], []
    for _ in range(nblocks):
        w1, b1 = lin(next(ki), hidden, hidden)
        w1, b1 = _fold_bn(w1, b1, *bn(next(ki), hidden))
        w2, b2 = lin(next(ki), hidden, hidden)
        w2, b2 = _fold_bn(w2, b2, *bn(next(ki), hidden))
        w1s.append(w1); b1s.append(b1); w2s.append(w2); b2s.append(b2)

    w_out, b_out = lin(next(ki), hidden, out_dim)

    return dict(
        w_in=w_in, b_in=b_in[None, :],
        w1=jnp.stack(w1s), b1=jnp.stack(b1s)[:, None, :],
        w2=jnp.stack(w2s), b2=jnp.stack(b2s)[:, None, :],
        w_out=w_out, b_out=b_out[None, :],
        nblocks=nblocks,
    )


def prepare_koopman_weights(weights, koopman_dim):
    """Fold the output layer into the scatter, duplicate angle columns, cast MXU operands to bf16."""
    kd = koopman_dim
    assert kd % 2 == 0, "koopman_dim must be even (2x2 rotation blocks)"
    cs_np, omat_np, kk_pad = _scatter_mats(kd)
    nang = kd // 2

    w_out = weights["w_out"]       # [hidden, out_dim] f32
    b_out = weights["b_out"]       # [1, out_dim]      f32
    omat = jnp.asarray(omat_np)

    # Angle head, duplicated so first kd/2 lanes get cos() and next kd/2 get sin().
    w_ang = jnp.concatenate([w_out[:, :nang], w_out[:, :nang]], axis=1)   # [hidden, kd]
    b_ang = jnp.concatenate([b_out[:, :nang], b_out[:, :nang]], axis=1)   # [1, kd]

    # Off-diagonal path folded into the output layer (exact: omat is one-hot, f32).
    w_off = w_out[:, nang:] @ omat                                        # [hidden, kk_pad]
    b_off = b_out[:, nang:] @ omat                                        # [1, kk_pad]

    bf16 = jnp.bfloat16
    operands = (
        weights["w_in"].astype(bf16), weights["b_in"],
        weights["w1"].astype(bf16), weights["b1"],
        weights["w2"].astype(bf16), weights["b2"],
        w_ang.astype(bf16), b_ang,
        jnp.asarray(cs_np).astype(bf16),
        w_off.astype(bf16), b_off,
    )
    return dict(operands=operands, kd=kd, kk_pad=kk_pad, nblocks=weights["nblocks"])


# --------------------------------------------------------------------------- #
# Wrapper
# --------------------------------------------------------------------------- #
def param_block_triangular_matrix(params_x, prepared, tb=256):
    kd = prepared["kd"]
    kk_pad = prepared["kk_pad"]
    nblocks = prepared["nblocks"]
    operands = prepared["operands"]

    batch, pd = params_x.shape
    tb = max(8, min(tb, _round_up(batch, 8)))     # batch tile (sublane multiple of 8)
    batch_pad = _round_up(batch, tb)

    x = params_x.astype(jnp.float32)
    if batch_pad != batch:
        x = jnp.pad(x, ((0, batch_pad - batch), (0, 0)))

    grid = (batch_pad // tb,)

    def _resident_spec(a):
        nd = a.ndim
        return pl.BlockSpec(a.shape, lambda i, _nd=nd: (0,) * _nd)

    in_specs = [pl.BlockSpec((tb, pd), lambda i: (i, 0))] + [_resident_spec(a) for a in operands]
    out_specs = pl.BlockSpec((tb, kk_pad), lambda i: (i, 0))

    # VMEM budget: resident weights + double-buffered x/out tiles + in-kernel activations.
    hidden = operands[0].shape[1]
    weight_bytes = sum(int(a.size) * a.dtype.itemsize for a in operands)
    tile_bytes = 2 * (tb * pd * 4 + tb * kk_pad * 4)
    act_bytes = tb * (8 * hidden + 2 * kk_pad) * 4
    vmem_limit = int(weight_bytes + tile_bytes + act_bytes) + (4 << 20)
    vmem_limit = max(8 << 20, min(vmem_limit, 32 << 20))

    kernel = functools.partial(_koopman_kernel, nblocks, kd)
    k_flat = pl.pallas_call(
        kernel,
        out_shape=jax.ShapeDtypeStruct((batch_pad, kk_pad), jnp.float32),
        grid=grid,
        in_specs=in_specs,
        out_specs=out_specs,
        compiler_params=pltpu.CompilerParams(
            dimension_semantics=("parallel",),
            vmem_limit_bytes=vmem_limit),
    )(x, *operands)

    return k_flat[:batch, :kd * kd].reshape(batch, kd, kd)


# --------------------------------------------------------------------------- #
# Pure-JAX / numpy reference (f32, reproduces the PyTorch forward semantics)
# --------------------------------------------------------------------------- #
def _reference(params_x, weights, koopman_dim):
    h = jnp.maximum(params_x @ weights["w_in"] + weights["b_in"], 0.0)
    for i in range(weights["nblocks"]):
        y = jnp.maximum(h @ weights["w1"][i] + weights["b1"][i], 0.0)
        y = y @ weights["w2"][i] + weights["b2"][i]
        h = jnp.maximum(h + y, 0.0)
    bt = h @ weights["w_out"] + weights["b_out"]
    diag, off = bt[:, : koopman_dim // 2], bt[:, koopman_dim // 2:]
    batch = bt.shape[0]
    K = np.zeros((batch, koopman_dim, koopman_dim), np.float32)
    diag = np.asarray(diag); off = np.asarray(off)
    for i in range(koopman_dim // 2):
        K[:, 2 * i, 2 * i] = np.cos(diag[:, i])
        K[:, 2 * i, 2 * i + 1] = -np.sin(diag[:, i])
        K[:, 2 * i + 1, 2 * i] = np.sin(diag[:, i])
        K[:, 2 * i + 1, 2 * i + 1] = np.cos(diag[:, i])
    mask = np.triu(np.ones((koopman_dim, koopman_dim), bool), 1)
    for i in range(koopman_dim // 2):
        mask[2 * i, 2 * i + 1] = False
    r, c = np.nonzero(mask)
    K[:, r, c] = off
    return K


if __name__ == "__main__":
    params_dim, koopman_dim, layers, hidden, batch = 4, 8, [2, 2], 64, 8

    key = jax.random.PRNGKey(0)
    k_w, k_x = jax.random.split(key)
    weights = init_params(k_w, params_dim, koopman_dim, layers, hidden)
    x = jax.random.normal(k_x, (batch, params_dim), jnp.float32)

    prepared = prepare_koopman_weights(weights, koopman_dim)
    K = param_block_triangular_matrix(x, prepared)
    K = jax.block_until_ready(K)

    K_ref = _reference(x, weights, koopman_dim)
    np.testing.assert_allclose(np.asarray(K), K_ref, atol=3e-2, rtol=3e-2)

    print("KERNEL_OK")
</pallas_src>

<mosaic_0001>
module attributes {stable_mosaic.version = 11 : i64} {
  func.func @_koopman_kernel(%arg0: i32, %arg1: memref<8x4xf32, #tpu.memory_space<vmem>>, %arg2: memref<4x64xbf16, #tpu.memory_space<vmem>>, %arg3: memref<1x64xf32, #tpu.memory_space<vmem>>, %arg4: memref<4x64x64xbf16, #tpu.memory_space<vmem>>, %arg5: memref<4x1x64xf32, #tpu.memory_space<vmem>>, %arg6: memref<4x64x64xbf16, #tpu.memory_space<vmem>>, %arg7: memref<4x1x64xf32, #tpu.memory_space<vmem>>, %arg8: memref<64x8xbf16, #tpu.memory_space<vmem>>, %arg9: memref<1x8xf32, #tpu.memory_space<vmem>>, %arg10: memref<8x128xbf16, #tpu.memory_space<vmem>>, %arg11: memref<64x128xbf16, #tpu.memory_space<vmem>>, %arg12: memref<1x128xf32, #tpu.memory_space<vmem>>, %arg13: memref<8x128xf32, #tpu.memory_space<vmem>>) attributes {dimension_semantics = [#tpu.dimension_semantics<parallel>], iteration_bounds = array<i64: 1>, scalar_prefetch = 0 : i64, scratch_operands = 0 : i64, tpu.core_type = #tpu.core_type<tc>, window_params = [{transform_indices = @transform_0, window_bounds = array<i64: 8, 4>}, {pipeline_mode = #tpu.pipeline_mode<synchronous>, transform_indices = @transform_1, window_bounds = array<i64: 4, 64>}, {pipeline_mode = #tpu.pipeline_mode<synchronous>, transform_indices = @transform_2, window_bounds = array<i64: 1, 64>}, {pipeline_mode = #tpu.pipeline_mode<synchronous>, transform_indices = @transform_3, window_bounds = array<i64: 4, 64, 64>}, {pipeline_mode = #tpu.pipeline_mode<synchronous>, transform_indices = @transform_4, window_bounds = array<i64: 4, 1, 64>}, {pipeline_mode = #tpu.pipeline_mode<synchronous>, transform_indices = @transform_5, window_bounds = array<i64: 4, 64, 64>}, {pipeline_mode = #tpu.pipeline_mode<synchronous>, transform_indices = @transform_6, window_bounds = array<i64: 4, 1, 64>}, {pipeline_mode = #tpu.pipeline_mode<synchronous>, transform_indices = @transform_7, window_bounds = array<i64: 64, 8>}, {pipeline_mode = #tpu.pipeline_mode<synchronous>, transform_indices = @transform_8, window_bounds = array<i64: 1, 8>}, {pipeline_mode = #tpu.pipeline_mode<synchronous>, transform_indices = @transform_9, window_bounds = array<i64: 8, 128>}, {pipeline_mode = #tpu.pipeline_mode<synchronous>, transform_indices = @transform_10, window_bounds = array<i64: 64, 128>}, {pipeline_mode = #tpu.pipeline_mode<synchronous>, transform_indices = @transform_11, window_bounds = array<i64: 1, 128>}, {transform_indices = @transform_12, window_bounds = array<i64: 8, 128>}]} {
    %c0 = arith.constant 0 : index
    %c0_0 = arith.constant 0 : index
    %0 = vector.load %arg1[%c0, %c0_0] : memref<8x4xf32, #tpu.memory_space<vmem>>, vector<8x4xf32>
    %1 = arith.truncf %0 : vector<8x4xf32> to vector<8x4xbf16>
    %c0_1 = arith.constant 0 : index
    %c0_2 = arith.constant 0 : index
    %2 = vector.load %arg2[%c0_1, %c0_2] : memref<4x64xbf16, #tpu.memory_space<vmem>>, vector<4x64xbf16>
    %cst = arith.constant dense<0.000000e+00> : vector<8x64xf32>
    %3 = tpu.matmul %1, %2, %cst {dimension_numbers = #tpu.dot_dimension_numbers<[1], [0], [0], [1], [0, 0, 1, 1], [], []>} : vector<8x4xbf16>, vector<4x64xbf16>, vector<8x64xf32> -> vector<8x64xf32>
    %c0_3 = arith.constant 0 : index
    %c0_4 = arith.constant 0 : index
    %4 = vector.load %arg3[%c0_3, %c0_4] : memref<1x64xf32, #tpu.memory_space<vmem>>, vector<1x64xf32>
    %5 = vector.broadcast %4 : vector<1x64xf32> to vector<8x64xf32>
    %6 = arith.addf %3, %5 : vector<8x64xf32>
    %cst_5 = arith.constant 0.000000e+00 : f32
    %7 = vector.broadcast %cst_5 : f32 to vector<8x64xf32>
    %8 = arith.maximumf %6, %7 : vector<8x64xf32>
    %9 = arith.truncf %8 : vector<8x64xf32> to vector<8x64xbf16>
    %c0_6 = arith.constant 0 : index
    %c0_7 = arith.constant 0 : index
    %c0_8 = arith.constant 0 : index
    %10 = vector.load %arg4[%c0_6, %c0_7, %c0_8] : memref<4x64x64xbf16, #tpu.memory_space<vmem>>, vector<1x64x64xbf16>
    %11 = vector.shape_cast %10 : vector<1x64x64xbf16> to vector<64x64xbf16>
    %cst_9 = arith.constant dense<0.000000e+00> : vector<8x64xf32>
    %12 = tpu.matmul %9, %11, %cst_9 {dimension_numbers = #tpu.dot_dimension_numbers<[1], [0], [0], [1], [0, 0, 1, 1], [], []>} : vector<8x64xbf16>, vector<64x64xbf16>, vector<8x64xf32> -> vector<8x64xf32>
    %c0_10 = arith.constant 0 : index
    %c0_11 = arith.constant 0 : index
    %c0_12 = arith.constant 0 : index
    %13 = vector.load %arg5[%c0_10, %c0_11, %c0_12] : memref<4x1x64xf32, #tpu.memory_space<vmem>>, vector<1x1x64xf32>
    %14 = vector.shape_cast %13 : vector<1x1x64xf32> to vector<1x64xf32>
    %15 = vector.broadcast %14 : vector<1x64xf32> to vector<8x64xf32>
    %16 = arith.addf %12, %15 : vector<8x64xf32>
    %cst_13 = arith.constant 0.000000e+00 : f32
    %17 = vector.broadcast %cst_13 : f32 to vector<8x64xf32>
    %18 = arith.maximumf %16, %17 : vector<8x64xf32>
    %19 = arith.truncf %18 : vector<8x64xf32> to vector<8x64xbf16>
    %c0_14 = arith.constant 0 : index
    %c0_15 = arith.constant 0 : index
    %c0_16 = arith.constant 0 : index
    %20 = vector.load %arg6[%c0_14, %c0_15, %c0_16] : memref<4x64x64xbf16, #tpu.memory_space<vmem>>, vector<1x64x64xbf16>
    %21 = vector.shape_cast %20 : vector<1x64x64xbf16> to vector<64x64xbf16>
    %cst_17 = arith.constant dense<0.000000e+00> : vector<8x64xf32>
    %22 = tpu.matmul %19, %21, %cst_17 {dimension_numbers = #tpu.dot_dimension_numbers<[1], [0], [0], [1], [0, 0, 1, 1], [], []>} : vector<8x64xbf16>, vector<64x64xbf16>, vector<8x64xf32> -> vector<8x64xf32>
    %c0_18 = arith.constant 0 : index
    %c0_19 = arith.constant 0 : index
    %c0_20 = arith.constant 0 : index
    %23 = vector.load %arg7[%c0_18, %c0_19, %c0_20] : memref<4x1x64xf32, #tpu.memory_space<vmem>>, vector<1x1x64xf32>
    %24 = vector.shape_cast %23 : vector<1x1x64xf32> to vector<1x64xf32>
    %25 = vector.broadcast %24 : vector<1x64xf32> to vector<8x64xf32>
    %26 = arith.addf %22, %25 : vector<8x64xf32>
    %27 = arith.addf %8, %26 : vector<8x64xf32>
    %cst_21 = arith.constant 0.000000e+00 : f32
    %28 = vector.broadcast %cst_21 : f32 to vector<8x64xf32>
    %29 = arith.maximumf %27, %28 : vector<8x64xf32>
    %30 = arith.truncf %29 : vector<8x64xf32> to vector<8x64xbf16>
    %c1 = arith.constant 1 : index
    %c0_22 = arith.constant 0 : index
    %c0_23 = arith.constant 0 : index
    %31 = vector.load %arg4[%c1, %c0_22, %c0_23] : memref<4x64x64xbf16, #tpu.memory_space<vmem>>, vector<1x64x64xbf16>
    %32 = vector.shape_cast %31 : vector<1x64x64xbf16> to vector<64x64xbf16>
    %cst_24 = arith.constant dense<0.000000e+00> : vector<8x64xf32>
    %33 = tpu.matmul %30, %32, %cst_24 {dimension_numbers = #tpu.dot_dimension_numbers<[1], [0], [0], [1], [0, 0, 1, 1], [], []>} : vector<8x64xbf16>, vector<64x64xbf16>, vector<8x64xf32> -> vector<8x64xf32>
    %c1_25 = arith.constant 1 : index
    %c0_26 = arith.constant 0 : index
    %c0_27 = arith.constant 0 : index
    %34 = vector.load %arg5[%c1_25, %c0_26, %c0_27] : memref<4x1x64xf32, #tpu.memory_space<vmem>>, vector<1x1x64xf32>
    %35 = vector.shape_cast %34 : vector<1x1x64xf32> to vector<1x64xf32>
    %36 = vector.broadcast %35 : vector<1x64xf32> to vector<8x64xf32>
    %37 = arith.addf %33, %36 : vector<8x64xf32>
    %cst_28 = arith.constant 0.000000e+00 : f32
    %38 = vector.broadcast %cst_28 : f32 to vector<8x64xf32>
    %39 = arith.maximumf %37, %38 : vector<8x64xf32>
    %40 = arith.truncf %39 : vector<8x64xf32> to vector<8x64xbf16>
    %c1_29 = arith.constant 1 : index
    %c0_30 = arith.constant 0 : index
    %c0_31 = arith.constant 0 : index
    %41 = vector.load %arg6[%c1_29, %c0_30, %c0_31] : memref<4x64x64xbf16, #tpu.memory_space<vmem>>, vector<1x64x64xbf16>
    %42 = vector.shape_cast %41 : vector<1x64x64xbf16> to vector<64x64xbf16>
    %cst_32 = arith.constant dense<0.000000e+00> : vector<8x64xf32>
    %43 = tpu.matmul %40, %42, %cst_32 {dimension_numbers = #tpu.dot_dimension_numbers<[1], [0], [0], [1], [0, 0, 1, 1], [], []>} : vector<8x64xbf16>, vector<64x64xbf16>, vector<8x64xf32> -> vector<8x64xf32>
    %c1_33 = arith.constant 1 : index
    %c0_34 = arith.constant 0 : index
    %c0_35 = arith.constant 0 : index
    %44 = vector.load %arg7[%c1_33, %c0_34, %c0_35] : memref<4x1x64xf32, #tpu.memory_space<vmem>>, vector<1x1x64xf32>
    %45 = vector.shape_cast %44 : vector<1x1x64xf32> to vector<1x64xf32>
    %46 = vector.broadcast %45 : vector<1x64xf32> to vector<8x64xf32>
    %47 = arith.addf %43, %46 : vector<8x64xf32>
    %48 = arith.addf %29, %47 : vector<8x64xf32>
    %cst_36 = arith.constant 0.000000e+00 : f32
    %49 = vector.broadcast %cst_36 : f32 to vector<8x64xf32>
    %50 = arith.maximumf %48, %49 : vector<8x64xf32>
    %51 = arith.truncf %50 : vector<8x64xf32> to vector<8x64xbf16>
    %c2 = arith.constant 2 : index
    %c0_37 = arith.constant 0 : index
    %c0_38 = arith.constant 0 : index
    %52 = vector.load %arg4[%c2, %c0_37, %c0_38] : memref<4x64x64xbf16, #tpu.memory_space<vmem>>, vector<1x64x64xbf16>
    %53 = vector.shape_cast %52 : vector<1x64x64xbf16> to vector<64x64xbf16>
    %cst_39 = arith.constant dense<0.000000e+00> : vector<8x64xf32>
    %54 = tpu.matmul %51, %53, %cst_39 {dimension_numbers = #tpu.dot_dimension_numbers<[1], [0], [0], [1], [0, 0, 1, 1], [], []>} : vector<8x64xbf16>, vector<64x64xbf16>, vector<8x64xf32> -> vector<8x64xf32>
    %c2_40 = arith.constant 2 : index
    %c0_41 = arith.constant 0 : index
    %c0_42 = arith.constant 0 : index
    %55 = vector.load %arg5[%c2_40, %c0_41, %c0_42] : memref<4x1x64xf32, #tpu.memory_space<vmem>>, vector<1x1x64xf32>
    %56 = vector.shape_cast %55 : vector<1x1x64xf32> to vector<1x64xf32>
    %57 = vector.broadcast %56 : vector<1x64xf32> to vector<8x64xf32>
    %58 = arith.addf %54, %57 : vector<8x64xf32>
    %cst_43 = arith.constant 0.000000e+00 : f32
    %59 = vector.broadcast %cst_43 : f32 to vector<8x64xf32>
    %60 = arith.maximumf %58, %59 : vector<8x64xf32>
    %61 = arith.truncf %60 : vector<8x64xf32> to vector<8x64xbf16>
    %c2_44 = arith.constant 2 : index
    %c0_45 = arith.constant 0 : index
    %c0_46 = arith.constant 0 : index
    %62 = vector.load %arg6[%c2_44, %c0_45, %c0_46] : memref<4x64x64xbf16, #tpu.memory_space<vmem>>, vector<1x64x64xbf16>
    %63 = vector.shape_cast %62 : vector<1x64x64xbf16> to vector<64x64xbf16>
    %cst_47 = arith.constant dense<0.000000e+00> : vector<8x64xf32>
    %64 = tpu.matmul %61, %63, %cst_47 {dimension_numbers = #tpu.dot_dimension_numbers<[1], [0], [0], [1], [0, 0, 1, 1], [], []>} : vector<8x64xbf16>, vector<64x64xbf16>, vector<8x64xf32> -> vector<8x64xf32>
    %c2_48 = arith.constant 2 : index
    %c0_49 = arith.constant 0 : index
    %c0_50 = arith.constant 0 : index
    %65 = vector.load %arg7[%c2_48, %c0_49, %c0_50] : memref<4x1x64xf32, #tpu.memory_space<vmem>>, vector<1x1x64xf32>
    %66 = vector.shape_cast %65 : vector<1x1x64xf32> to vector<1x64xf32>
    %67 = vector.broadcast %66 : vector<1x64xf32> to vector<8x64xf32>
    %68 = arith.addf %64, %67 : vector<8x64xf32>
    %69 = arith.addf %50, %68 : vector<8x64xf32>
    %cst_51 = arith.constant 0.000000e+00 : f32
    %70 = vector.broadcast %cst_51 : f32 to vector<8x64xf32>
    %71 = arith.maximumf %69, %70 : vector<8x64xf32>
    %72 = arith.truncf %71 : vector<8x64xf32> to vector<8x64xbf16>
    %c3 = arith.constant 3 : index
    %c0_52 = arith.constant 0 : index
    %c0_53 = arith.constant 0 : index
    %73 = vector.load %arg4[%c3, %c0_52, %c0_53] : memref<4x64x64xbf16, #tpu.memory_space<vmem>>, vector<1x64x64xbf16>
    %74 = vector.shape_cast %73 : vector<1x64x64xbf16> to vector<64x64xbf16>
    %cst_54 = arith.constant dense<0.000000e+00> : vector<8x64xf32>
    %75 = tpu.matmul %72, %74, %cst_54 {dimension_numbers = #tpu.dot_dimension_numbers<[1], [0], [0], [1], [0, 0, 1, 1], [], []>} : vector<8x64xbf16>, vector<64x64xbf16>, vector<8x64xf32> -> vector<8x64xf32>
    %c3_55 = arith.constant 3 : index
    %c0_56 = arith.constant 0 : index
    %c0_57 = arith.constant 0 : index
    %76 = vector.load %arg5[%c3_55, %c0_56, %c0_57] : memref<4x1x64xf32, #tpu.memory_space<vmem>>, vector<1x1x64xf32>
    %77 = vector.shape_cast %76 : vector<1x1x64xf32> to vector<1x64xf32>
    %78 = vector.broadcast %77 : vector<1x64xf32> to vector<8x64xf32>
    %79 = arith.addf %75, %78 : vector<8x64xf32>
    %cst_58 = arith.constant 0.000000e+00 : f32
    %80 = vector.broadcast %cst_58 : f32 to vector<8x64xf32>
    %81 = arith.maximumf %79, %80 : vector<8x64xf32>
    %82 = arith.truncf %81 : vector<8x64xf32> to vector<8x64xbf16>
    %c3_59 = arith.constant 3 : index
    %c0_60 = arith.constant 0 : index
    %c0_61 = arith.constant 0 : index
    %83 = vector.load %arg6[%c3_59, %c0_60, %c0_61] : memref<4x64x64xbf16, #tpu.memory_space<vmem>>, vector<1x64x64xbf16>
    %84 = vector.shape_cast %83 : vector<1x64x64xbf16> to vector<64x64xbf16>
    %cst_62 = arith.constant dense<0.000000e+00> : vector<8x64xf32>
    %85 = tpu.matmul %82, %84, %cst_62 {dimension_numbers = #tpu.dot_dimension_numbers<[1], [0], [0], [1], [0, 0, 1, 1], [], []>} : vector<8x64xbf16>, vector<64x64xbf16>, vector<8x64xf32> -> vector<8x64xf32>
    %c3_63 = arith.constant 3 : index
    %c0_64 = arith.constant 0 : index
    %c0_65 = arith.constant 0 : index
    %86 = vector.load %arg7[%c3_63, %c0_64, %c0_65] : memref<4x1x64xf32, #tpu.memory_space<vmem>>, vector<1x1x64xf32>
    %87 = vector.shape_cast %86 : vector<1x1x64xf32> to vector<1x64xf32>
    %88 = vector.broadcast %87 : vector<1x64xf32> to vector<8x64xf32>
    %89 = arith.addf %85, %88 : vector<8x64xf32>
    %90 = arith.addf %71, %89 : vector<8x64xf32>
    %cst_66 = arith.constant 0.000000e+00 : f32
    %91 = vector.broadcast %cst_66 : f32 to vector<8x64xf32>
    %92 = arith.maximumf %90, %91 : vector<8x64xf32>
    %93 = arith.truncf %92 : vector<8x64xf32> to vector<8x64xbf16>
    %c0_67 = arith.constant 0 : index
    %c0_68 = arith.constant 0 : index
    %94 = vector.load %arg8[%c0_67, %c0_68] : memref<64x8xbf16, #tpu.memory_space<vmem>>, vector<64x8xbf16>
    %cst_69 = arith.constant dense<0.000000e+00> : vector<8x8xf32>
    %95 = tpu.matmul %93, %94, %cst_69 {dimension_numbers = #tpu.dot_dimension_numbers<[1], [0], [0], [1], [0, 0, 1, 1], [], []>} : vector<8x64xbf16>, vector<64x8xbf16>, vector<8x8xf32> -> vector<8x8xf32>
    %c0_70 = arith.constant 0 : index
    %c0_71 = arith.constant 0 : index
    %96 = vector.load %arg9[%c0_70, %c0_71] : memref<1x8xf32, #tpu.memory_space<vmem>>, vector<1x8xf32>
    %97 = vector.broadcast %96 : vector<1x8xf32> to vector<8x8xf32>
    %98 = arith.addf %95, %97 : vector<8x8xf32>
    %99 = tpu.iota {dimensions = array<i32: 1>} : vector<8x8xi32>
    %c4_i32 = arith.constant 4 : i32
    %100 = vector.broadcast %c4_i32 : i32 to vector<8x8xi32>
    %101 = arith.cmpi slt, %99, %100 : vector<8x8xi32>
    %102 = math.cos %98 : vector<8x8xf32>
    %103 = math.sin %98 : vector<8x8xf32>
    %104 = arith.select %101, %102, %103 : vector<8x8xi1>, vector<8x8xf32>
    %105 = arith.truncf %104 : vector<8x8xf32> to vector<8x8xbf16>
    %c0_72 = arith.constant 0 : index
    %c0_73 = arith.constant 0 : index
    %106 = vector.load %arg10[%c0_72, %c0_73] : memref<8x128xbf16, #tpu.memory_space<vmem>>, vector<8x128xbf16>
    %cst_74 = arith.constant dense<0.000000e+00> : vector<8x128xf32>
    %107 = tpu.matmul %105, %106, %cst_74 {dimension_numbers = #tpu.dot_dimension_numbers<[1], [0], [0], [1], [0, 0, 1, 1], [], []>} : vector<8x8xbf16>, vector<8x128xbf16>, vector<8x128xf32> -> vector<8x128xf32>
    %c0_75 = arith.constant 0 : index
    %c0_76 = arith.constant 0 : index
    %108 = vector.load %arg11[%c0_75, %c0_76] : memref<64x128xbf16, #tpu.memory_space<vmem>>, vector<64x128xbf16>
    %cst_77 = arith.constant dense<0.000000e+00> : vector<8x128xf32>
    %109 = tpu.matmul %93, %108, %cst_77 {dimension_numbers = #tpu.dot_dimension_numbers<[1], [0], [0], [1], [0, 0, 1, 1], [], []>} : vector<8x64xbf16>, vector<64x128xbf16>, vector<8x128xf32> -> vector<8x128xf32>
    %110 = arith.addf %107, %109 : vector<8x128xf32>
    %c0_78 = arith.constant 0 : index
    %c0_79 = arith.constant 0 : index
    %111 = vector.load %arg12[%c0_78, %c0_79] : memref<1x128xf32, #tpu.memory_space<vmem>>, vector<1x128xf32>
    %112 = vector.broadcast %111 : vector<1x128xf32> to vector<8x128xf32>
    %113 = arith.addf %110, %112 : vector<8x128xf32>
    %c0_80 = arith.constant 0 : index
    %c0_81 = arith.constant 0 : index
    %114 = vector.load %arg13[%c0_80, %c0_81] : memref<8x128xf32, #tpu.memory_space<vmem>>, vector<8x128xf32>
    tpu.vector_store %arg13[%c0_80, %c0_81], %113 {strides = array<i32>} : memref<8x128xf32, #tpu.memory_space<vmem>>, vector<8x128xf32>,
    return
  }
  func.func @transform_0(%arg0: i32) -> (i32, i32) {
    %c0_i32 = arith.constant 0 : i32
    %c0_i32_0 = arith.constant 0 : i32
    return %arg0, %c0_i32 : i32, i32
  }
  func.func @transform_1(%arg0: i32) -> (i32, i32) {
    %c0_i32 = arith.constant 0 : i32
    %c0_i32_0 = arith.constant 0 : i32
    %c0_i32_1 = arith.constant 0 : i32
    return %c0_i32, %c0_i32_0 : i32, i32
  }
  func.func @transform_2(%arg0: i32) -> (i32, i32) {
    %c0_i32 = arith.constant 0 : i32
    %c0_i32_0 = arith.constant 0 : i32
    %c0_i32_1 = arith.constant 0 : i32
    return %c0_i32, %c0_i32_0 : i32, i32
  }
  func.func @transform_3(%arg0: i32) -> (i32, i32, i32) {
    %c0_i32 = arith.constant 0 : i32
    %c0_i32_0 = arith.constant 0 : i32
    %c0_i32_1 = arith.constant 0 : i32
    %c0_i32_2 = arith.constant 0 : i32
    return %c0_i32, %c0_i32_0, %c0_i32_1 : i32, i32, i32
  }
  func.func @transform_4(%arg0: i32) -> (i32, i32, i32) {
    %c0_i32 = arith.constant 0 : i32
    %c0_i32_0 = arith.constant 0 : i32
    %c0_i32_1 = arith.constant 0 : i32
    %c0_i32_2 = arith.constant 0 : i32
    return %c0_i32, %c0_i32_0, %c0_i32_1 : i32, i32, i32
  }
  func.func @transform_5(%arg0: i32) -> (i32, i32, i32) {
    %c0_i32 = arith.constant 0 : i32
    %c0_i32_0 = arith.constant 0 : i32
    %c0_i32_1 = arith.constant 0 : i32
    %c0_i32_2 = arith.constant 0 : i32
    return %c0_i32, %c0_i32_0, %c0_i32_1 : i32, i32, i32
  }
  func.func @transform_6(%arg0: i32) -> (i32, i32, i32) {
    %c0_i32 = arith.constant 0 : i32
    %c0_i32_0 = arith.constant 0 : i32
    %c0_i32_1 = arith.constant 0 : i32
    %c0_i32_2 = arith.constant 0 : i32
    return %c0_i32, %c0_i32_0, %c0_i32_1 : i32, i32, i32
  }
  func.func @transform_7(%arg0: i32) -> (i32, i32) {
    %c0_i32 = arith.constant 0 : i32
    %c0_i32_0 = arith.constant 0 : i32
    %c0_i32_1 = arith.constant 0 : i32
    return %c0_i32, %c0_i32_0 : i32, i32
  }
  func.func @transform_8(%arg0: i32) -> (i32, i32) {
    %c0_i32 = arith.constant 0 : i32
    %c0_i32_0 = arith.constant 0 : i32
    %c0_i32_1 = arith.constant 0 : i32
    return %c0_i32, %c0_i32_0 : i32, i32
  }
  func.func @transform_9(%arg0: i32) -> (i32, i32) {
    %c0_i32 = arith.constant 0 : i32
    %c0_i32_0 = arith.constant 0 : i32
    %c0_i32_1 = arith.constant 0 : i32
    return %c0_i32, %c0_i32_0 : i32, i32
  }
  func.func @transform_10(%arg0: i32) -> (i32, i32) {
    %c0_i32 = arith.constant 0 : i32
    %c0_i32_0 = arith.constant 0 : i32
    %c0_i32_1 = arith.constant 0 : i32
    return %c0_i32, %c0_i32_0 : i32, i32
  }
  func.func @transform_11(%arg0: i32) -> (i32, i32) {
    %c0_i32 = arith.constant 0 : i32
    %c0_i32_0 = arith.constant 0 : i32
    %c0_i32_1 = arith.constant 0 : i32
    return %c0_i32, %c0_i32_0 : i32, i32
  }
  func.func @transform_12(%arg0: i32) -> (i32, i32) {
    %c0_i32 = arith.constant 0 : i32
    %c0_i32_0 = arith.constant 0 : i32
    return %arg0, %c0_i32 : i32, i32
  }
}

</mosaic_0001>

<bundles_post_ra>
// kernel: tpu_custom_call.1
= control target key start
LH: loop header
LB: loop body
LE: loop exit
PB: predicated region body
PF: predicated region fallthrough
CT: control target
= control target key end

     0   :  { %17 = vsyncpa [#allocation3], 0  ;;  %s1596_s0 = inlined_call_operand.vmem [shape: f32[8,4], index: 0, kind: input, shape index: {}]   ;;  %s1597_s1 = inlined_call_operand.hbm [shape: bf16[4,64], index: 1, kind: input, shape index: {}]   ;;  %s1598_s2 = inlined_call_operand.vmem [shape: f32[1,64], index: 2, kind: input, shape index: {}]   ;;  %s1599_s3 = inlined_call_operand.hbm [shape: bf16[4,64,64], index: 3, kind: input, shape index: {}]   ;;  %s1600_s4 = inlined_call_operand.vmem [shape: f32[4,1,64], index: 4, kind: input, shape index: {}]   ;;  %s1601_s5 = inlined_call_operand.hbm [shape: bf16[4,64,64], index: 5, kind: input, shape index: {}]   ;;  %s1602_s6 = inlined_call_operand.vmem [shape: f32[4,1,64], index: 6, kind: input, shape index: {}]   ;;  %s1603_s7 = inlined_call_operand.vmem [shape: bf16[64,8], index: 7, kind: input, shape index: {}]   ;;  %s1604_s8 = inlined_call_operand.vmem [shape: f32[1,8], index: 8, kind: input, shape index: {}]   ;;  %s1605_s9 = inlined_call_operand.vmem [shape: bf16[8,128], index: 9, kind: input, shape index: {}]   ;;  %s1606_s10 = inlined_call_operand.vmem [shape: bf16[64,128], index: 10, kind: input, shape index: {}]   ;;  %s1607_s11 = inlined_call_operand.vmem [shape: f32[1,128], index: 11, kind: input, shape index: {}]   ;;  %s1608_s12 = inlined_call_operand.hbm [shape: f32[8,128], index: 12, kind: output, shape index: {}]  }
   0x1   :  { %18 = vsyncpa [#allocation6], 0  ;;  %s39_s23 = sshll.u32 %s1599_s3, 4  ;;  %s40_s23 = int_to_ptr.hbm [resolvable:$true] %s39_s23 }
   0x2   :  { %19 = vsyncpa [#allocation4], 0  ;;  %s1374_s24 = smov [#allocation5]   ;;  %s27_s28 = sshll.u32 %s1597_s1, 4  ;;  %s28_s28 = int_to_ptr.hbm [resolvable:$true] %s27_s28 }
   0x3   :  { %s41_s25 = sshll.u32 %s1374_s24, 4  ;;  %s1375_s29 = smov 64   ;;  %s42_s25 = int_to_ptr.vmem [resolvable:$true] %s41_s25 }
   0x4   :  { %s1376_s30 = smov 4   ;;  %s1377_s13 = smov [#allocation2]  }
   0x5   :  { %47 = dma.hbm_to_vmem [thread:$0]  %s40_s23, 2048, %s42_s25, [#allocation6], %s1375_s29, %s1375_s29, %s1376_s30  }
   0x6   :  { %s29_s14 = sshll.u32 %s1377_s13, 4  ;;  %s54_s17 = sshll.u32 %s1601_s5, 4  ;;  %s30_s14 = int_to_ptr.vmem [resolvable:$true] %s29_s14  ;;  %s55_s17 = int_to_ptr.hbm [resolvable:$true] %s54_s17 }
   0x7   :  { %32 = dma.hbm_to_vmem [thread:$0]  %s28_s28, 32, %s30_s14, [#allocation3]  }
   0x8   :  { %s1378_s3 = smov [#allocation7]  }
   0x9   :  { %s56_s18 = sshll.u32 %s1378_s3, 4  ;;  %s57_s18 = int_to_ptr.vmem [resolvable:$true] %s56_s18 }
   0xa   :  { %62 = dma.hbm_to_vmem [thread:$0]  %s55_s17, 2048, %s57_s18, [#allocation6], %s1375_s29, %s1375_s29, %s1376_s30  }
   0xb   :  { %1368 = dma.done.wait [#allocation3], 32  }
   0xc   :  { %1369 = vsyncadd [#allocation3], 4294967264 }
   0xd   :  { %1370 = dma.done.wait [#allocation6], 4096  }
   0xe   :  { %1371 = vsyncadd [#allocation6], 4294963200  ;;  %vm99_vm0 = vcmask 1041408   ;;  %v90_v0 = vld [vmem:[#allocation2] sm:$0x3]  ;;  %vm95_vm1 = vcmask 31744  }
   0xf   :  { %v88_v1 = vld [vmem:[%s1596_s0] sm:$0xff]  ;;  %v101_v3 = vsel %vm99_vm0, %v90_v0, 0  ;;  %v1210_v5 = vld [vmem:[#allocation5 + $0x10] sm:$0xff]  ;;  %v1209_v6 = vld [vmem:[#allocation5 + $0x8] sm:$0xff]  ;;  %vm154_vm2 = vcmask 523264   ;;  %vm983_vm15 = vcmask 1043456  }
  0x10   :  { %v1211_v2 = vld [vmem:[#allocation5 + $0x18] sm:$0xff]  ;;  %v89_v4 = vpack.c.bf16 %v88_v1, %v88_v1  ;;  %110 = vmatpush.bf16.msra.mxu0 %v101_v3  ;;  %v1208_v7 = vld [vmem:[#allocation5] sm:$0xff]  ;;  %v1214_v9 = vld [vmem:[#allocation7 + $0x10] sm:$0xff]  ;;  %s1386_s28 = smov [#allocation8]   ;;  %s1013_s14 = sshll.u32 %s1608_s12, 4  ;;  %s1014_s14 = int_to_ptr.hbm [resolvable:$true] %s1013_s14 }
  0x11   :  { %162 = vmatpush.bf16.msra.mxu1 %v1211_v2  ;;  %v1215_v8 = vld [vmem:[#allocation7 + $0x18] sm:$0xff]  ;;  %v1213_v16 = vld [vmem:[#allocation7 + $0x8] sm:$0xff]  ;;  %v1212_v17 = vld [vmem:[#allocation7] sm:$0xff]  ;;  %s1011_s29 = sshll.u32 %s1386_s28, 4  ;;  %s1012_s29 = int_to_ptr.vmem [resolvable:$true] %s1011_s29 }
  0x12   :  { %216 = vmatpush.bf16.msra.mxu2 %v1215_v8  ;;  %v1261_v10 = vld [vmem:[%s1598_s2] ss:$0 sm:$0xff]  ;;  %v1218_v19 = vld [vmem:[#allocation5 + $0x30] sm:$0xff]  ;;  %v1217_v26 = vld [vmem:[#allocation5 + $0x28] sm:$0xff] }
  0x13   :  { %1024 = vmatmul.msk.bf16.vlgmr.msra.gmra.mxu0 %vm95_vm1, %v89_v4  ;;  %v1219_v18 = vld [vmem:[#allocation5 + $0x38] sm:$0xff]  ;;  %v1216_v27 = vld [vmem:[#allocation5 + $0x20] sm:$0xff]  ;;  %v1222_v29 = vld [vmem:[#allocation7 + $0x30] sm:$0xff] }
  0x14   :  { %273 = vmatpush.bf16.msra.mxu3 %v1219_v18  ;;  %v1262_v20 = vld [vmem:[%s1600_s4] ss:$0 sm:$0xff]  ;;  %v1221_v30 = vld [vmem:[#allocation7 + $0x28] sm:$0xff]  ;;  %v1220_v38 = vld [vmem:[#allocation7 + $0x20] sm:$0xff] }
  0x15   :  { %163 = vmatpush.bf16.msra.mxu1 %v1210_v5  ;;  %v1223_v28 = vld [vmem:[#allocation7 + $0x38] sm:$0xff]  ;;  %v1226_v40 = vld [vmem:[#allocation5 + $0x50] sm:$0xff]  ;;  %v1225_v47 = vld [vmem:[#allocation5 + $0x48] sm:$0xff] }
  0x16   :  { %217 = vmatpush.bf16.msra.mxu2 %v1214_v9  ;;  %329 = vmatpush.bf16.msrb.mxu0 %v1223_v28  ;;  %v1263_v31 = vld [vmem:[%s1602_s6] ss:$0 sm:$0xff]  ;;  %v1264_v41 = vld [vmem:[%s1600_s4 + $0x1] ss:$0 sm:$0xff]  ;;  %v1224_v48 = vld [vmem:[#allocation5 + $0x40] sm:$0xff] }
  0x17   :  { %v1227_v39 = vld [vmem:[#allocation5 + $0x58] sm:$0xff]  ;;  %v1230_v50 = vld [vmem:[#allocation7 + $0x50] sm:$0xff]  ;;  %v1229_v51 = vld [vmem:[#allocation7 + $0x48] sm:$0xff] }
  0x18   :  { %274 = vmatpush.bf16.msra.mxu3 %v1218_v19  ;;  %v1231_v49 = vld [vmem:[#allocation7 + $0x58] sm:$0xff]  ;;  %v1228_v59 = vld [vmem:[#allocation7 + $0x40] sm:$0xff]  ;;  %v1234_v61 = vld [vmem:[#allocation5 + $0x70] sm:$0xff] }
  0x19   :  { %164 = vmatpush.bf16.msra.mxu1 %v1209_v6  ;;  %v1265_v52 = vld [vmem:[%s1602_s6 + $0x1] ss:$0 sm:$0xff]  ;;  %v1266_v62 = vld [vmem:[%s1600_s4 + $0x2] ss:$0 sm:$0xff]  ;;  %v1233_v4 = vld [vmem:[#allocation5 + $0x68] sm:$0xff] }
  0x1a   :  { %218 = vmatpush.bf16.msra.mxu2 %v1213_v16  ;;  %330 = vmatpush.bf16.msrb.mxu0 %v1222_v29  ;;  %v1235_v60 = vld [vmem:[#allocation5 + $0x78] sm:$0xff]  ;;  %v1232_v5 = vld [vmem:[#allocation5 + $0x60] sm:$0xff]  ;;  %v1237_v8 = vld [vmem:[#allocation7 + $0x68] sm:$0xff] }
  0x1b   :  { %v1239_v6 = vld [vmem:[#allocation7 + $0x78] sm:$0xff]  ;;  %v1267_v9 = vld [vmem:[%s1602_s6 + $0x2] ss:$0 sm:$0xff]  ;;  %v1242_v19 = vld [vmem:[%s1603_s7 + $0x10] sm:$0xff] }
  0x1c   :  { %275 = vmatpush.bf16.msra.mxu3 %v1217_v26  ;;  %v1236_v16 = vld [vmem:[#allocation7 + $0x60] sm:$0xff]  ;;  %v1247_v18 = vld [vmem:[%s1606_s10 + $0x18] sm:$0xff] }
  0x1d   :  { %165 = vmatpush.bf16.msra.mxu1 %v1208_v7  ;;  %v1238_v7 = vld [vmem:[#allocation7 + $0x70] sm:$0xff]  ;;  %v1245_v28 = vld [vmem:[%s1606_s10 + $0x8] sm:$0xff]  ;;  %v1240_v29 = vld [vmem:[%s1603_s7] sm:$0xff] }
  0x1e   :  { %219 = vmatpush.bf16.msra.mxu2 %v1212_v17  ;;  %331 = vmatpush.bf16.msrb.mxu0 %v1221_v30  ;;  %v1243_v17 = vld [vmem:[%s1603_s7 + $0x18] sm:$0xff]  ;;  %v1244_v30 = vld [vmem:[%s1606_s10] sm:$0xff] }
  0x20   :  { %276 = vmatpush.bf16.msra.mxu3 %v1216_v27  ;;  %v1241_v27 = vld [vmem:[%s1603_s7 + $0x8] sm:$0xff] }
  0x21   :  { %386 = vmatpush.bf16.msrb.mxu1 %v1227_v39 }
  0x22   :  { %332 = vmatpush.bf16.msrb.mxu0 %v1220_v38  ;;  %442 = vmatpush.bf16.msrb.mxu2 %v1231_v49  ;;  %v1270_v38 = vld [vmem:[%s1604_s8] ss:$0 sm:$0xff] }
  0x24   :  { %499 = vmatpush.bf16.msrb.mxu3 %v1235_v60  ;;  %v1381_v60 = vmov 2131351028  }
  0x25   :  { %387 = vmatpush.bf16.msrb.mxu1 %v1226_v40 }
  0x26   :  { %443 = vmatpush.bf16.msrb.mxu2 %v1230_v50  ;;  %555 = vmatpush.bf16.msra.mxu0 %v1239_v6 }
  0x28   :  { %500 = vmatpush.bf16.msrb.mxu3 %v1234_v61 }
  0x29   :  { %388 = vmatpush.bf16.msrb.mxu1 %v1225_v47 }
  0x2a   :  { %444 = vmatpush.bf16.msrb.mxu2 %v1229_v51  ;;  %556 = vmatpush.bf16.msra.mxu0 %v1238_v7 }
  0x2c   :  { %501 = vmatpush.bf16.msrb.mxu3 %v1233_v4 }
  0x2d   :  { %389 = vmatpush.bf16.msrb.mxu1 %v1224_v48 }
  0x2e   :  { %445 = vmatpush.bf16.msrb.mxu2 %v1228_v59  ;;  %557 = vmatpush.bf16.msra.mxu0 %v1237_v8 }
  0x30   :  { %502 = vmatpush.bf16.msrb.mxu3 %v1232_v5  ;;  %v1384_v5 = vmov 1326507024  }
  0x32   :  { %558 = vmatpush.bf16.msra.mxu0 %v1236_v16 }
  0x90   :  { %v112_v11 = vpop.f32.mrf.mxu0 }
  0x91   :  { %v113_v12 = vadd.f32 %v1261_v10, %v112_v11 }
  0x93   :  { %v116_v13 = vmax.f32 %v113_v12, 0.0 }
  0x95   :  { %v117_v14 = vpack.c.bf16 %v116_v13, %v116_v13 }
  0x97   :  { %1041 = vmatmul.msk.bf16.vlgmr.msra.gmra.mxu1 %vm154_vm2, %v117_v14 }
  0x98   :  { %v114_v15 = vpop.f32.mrf.mxu0  ;;  %610 = vmatpush.bf16.msra.mxu1 %v1243_v17 }
  0x9c   :  { %611 = vmatpush.bf16.msra.mxu1 %v1242_v19 }
  0xa0   :  { %612 = vmatpush.bf16.msra.mxu1 %v1241_v27 }
  0xa4   :  { %613 = vmatpush.bf16.msra.mxu1 %v1240_v29 }
 0x114   :  { %v167_v21 = vpop.f32.mrf.mxu1 }
 0x115   :  { %v168_v22 = vadd.f32 %v1262_v20, %v167_v21  ;;  %v1246_v20 = vld [vmem:[%s1606_s10 + $0x10] sm:$0xff]  ;;  %v1268_v21 = vld [vmem:[%s1600_s4 + $0x3] ss:$0 sm:$0xff] }
 0x117   :  { %v171_v23 = vmax.f32 %v168_v22, 0.0 }
 0x119   :  { %v172_v24 = vpack.c.bf16 %v171_v23, %v171_v23 }
 0x11b   :  { %1058 = vmatmul.msk.bf16.vlgmr.msra.gmra.mxu2 %vm154_vm2, %v172_v24 }
 0x11c   :  { %v169_v25 = vpop.f32.mrf.mxu1  ;;  %970 = vmatpush.bf16.msra.mxu2 %v1247_v18 }
 0x120   :  { %971 = vmatpush.bf16.msra.mxu2 %v1246_v20 }
 0x124   :  { %972 = vmatpush.bf16.msra.mxu2 %v1245_v28 }
 0x128   :  { %973 = vmatpush.bf16.msra.mxu2 %v1244_v30 }
 0x19e   :  { %v221_v32 = vpop.f32.mrf.mxu2 }
 0x19f   :  { %v222_v33 = vadd.f32 %v1263_v31, %v221_v32  ;;  %v1269_v31 = vld [vmem:[%s1602_s6 + $0x3] ss:$0 sm:$0xff] }
 0x1a1   :  { %v225_v34 = vadd.f32 %v222_v33, %v116_v13 }
 0x1a3   :  { %v226_v35 = vmax.f32 %v225_v34, 0.0 }
 0x1a5   :  { %v227_v36 = vpack.c.bf16 %v226_v35, %v226_v35 }
 0x1a6   :  { %v223_v37 = vpop.f32.mrf.mxu2 }
 0x1a7   :  { %1076 = vmatmul.msk.bf16.vlgmr.msra.gmra.mxu3 %vm154_vm2, %v227_v36 }
 0x22a   :  { %v278_v42 = vpop.f32.mrf.mxu3 }
 0x22b   :  { %v279_v43 = vadd.f32 %v1264_v41, %v278_v42 }
 0x22d   :  { %v282_v44 = vmax.f32 %v279_v43, 0.0 }
 0x22f   :  { %v283_v45 = vpack.c.bf16 %v282_v44, %v282_v44 }
 0x231   :  { %1094 = vmatmul.msk.bf16.vlgmr.msrb.gmra.mxu0 %vm154_vm2, %v283_v45 }
 0x232   :  { %v280_v46 = vpop.f32.mrf.mxu3 }
 0x2ae   :  { %v334_v53 = vpop.f32.mrf.mxu0 }
 0x2af   :  { %v335_v54 = vadd.f32 %v1265_v52, %v334_v53 }
 0x2b1   :  { %v338_v55 = vadd.f32 %v335_v54, %v226_v35 }
 0x2b3   :  { %v339_v56 = vmax.f32 %v338_v55, 0.0  ;;  %v1379_v55 = vmov 683565275  }
 0x2b5   :  { %v340_v57 = vpack.c.bf16 %v339_v56, %v339_v56 }
 0x2b6   :  { %v336_v58 = vpop.f32.mrf.mxu0 }
 0x2b7   :  { %1112 = vmatmul.msk.bf16.vlgmr.msrb.gmra.mxu1 %vm154_vm2, %v340_v57  ;;  %v1380_v57 = vmov 2475754826  }
 0x334   :  { %v391_v63 = vpop.f32.mrf.mxu1 }
 0x335   :  { %v392_v0 = vadd.f32 %v1266_v62, %v391_v63  ;;  %v1382_v63 = vmov 2102212464  }
 0x337   :  { %v395_v1 = vmax.f32 %v392_v0, 0.0 }
 0x339   :  { %v396_v2 = vpack.c.bf16 %v395_v1, %v395_v1 }
 0x33b   :  { %1130 = vmatmul.msk.bf16.vlgmr.msrb.gmra.mxu2 %vm154_vm2, %v396_v2  ;;  %v1383_v2 = vmov 920167782  }
 0x33c   :  { %v393_v3 = vpop.f32.mrf.mxu1 }
 0x3be   :  { %v447_v10 = vpop.f32.mrf.mxu2 }
 0x3bf   :  { %v448_v11 = vadd.f32 %v1267_v9, %v447_v10 }
 0x3c1   :  { %v451_v12 = vadd.f32 %v448_v11, %v339_v56 }
 0x3c3   :  { %v452_v13 = vmax.f32 %v451_v12, 0.0 }
 0x3c5   :  { %v453_v14 = vpack.c.bf16 %v452_v13, %v452_v13 }
 0x3c6   :  { %v449_v15 = vpop.f32.mrf.mxu2 }
 0x3c7   :  { %1148 = vmatmul.msk.bf16.vlgmr.msrb.gmra.mxu3 %vm154_vm2, %v453_v14 }
 0x44a   :  { %v504_v22 = vpop.f32.mrf.mxu3 }
 0x44b   :  { %v505_v23 = vadd.f32 %v1268_v21, %v504_v22 }
 0x44d   :  { %v508_v24 = vmax.f32 %v505_v23, 0.0 }
 0x44f   :  { %v509_v25 = vpack.c.bf16 %v508_v24, %v508_v24 }
 0x451   :  { %1166 = vmatmul.msk.bf16.vlgmr.msra.gmra.mxu0 %vm154_vm2, %v509_v25 }
 0x452   :  { %v506_v26 = vpop.f32.mrf.mxu3 }
 0x4ce   :  { %v560_v32 = vpop.f32.mrf.mxu0 }
 0x4cf   :  { %v561_v33 = vadd.f32 %v1269_v31, %v560_v32 }
 0x4d1   :  { %v564_v34 = vadd.f32 %v561_v33, %v452_v13 }
 0x4d3   :  { %v565_v35 = vmax.f32 %v564_v34, 0.0 }
 0x4d5   :  { %v566_v36 = vpack.c.bf16 %v565_v35, %v565_v35 }
 0x4d6   :  { %v562_v37 = vpop.f32.mrf.mxu0 }
 0x4d7   :  { %1183 = vmatmul.msk.bf16.vlgmr.msra.gmra.mxu1 %vm154_vm2, %v566_v36  ;;  %1206 = vmatmul.msk.bf16.vlgmr.msra.gmra.mxu2 %vm154_vm2, %v566_v36 }
 0x554   :  { %v615_v39 = vpop.f32.mrf.mxu1 }
 0x555   :  { %v1528_v40 = vadd.f32 %v1270_v38, %v615_v39  ;;  %v1385_v39 = vmov 0  }
 0x557   :  { %v625_v41 = vand.u32 2139095040, %v1528_v40  ;;  %v622_v45 = vand.u32 2147483647, %v1528_v40  ;;  %vm624_vm0 = vcmp.lt.s32.totalorder %v1528_v40, 0 }
 0x559   :  { %v626_v42 = vshrl.u32 %v625_v41, 23  ;;  %v629_v48 = vand.u32 8388607, %v622_v45  ;;  %vm623_vm1 = vcmp.le.f32.partialorder %v622_v45, 0.7853982 }
 0x55a   :  { %v1531_v43 = vpop.f32.mrf.mxu2 }
 0x55b   :  { %v1184_v44 = vadd.s32 4294967169, %v626_v42  ;;  %v630_v53 = vor.u32 8388608, %v629_v48 }
 0x55c   :  { %v617_v46 = vpop.f32.mrf.mxu1 }
 0x55d   :  { %v632_v47 = vadd.s32 1, %v1184_v44  ;;  %v1547_v12 = vshll.u32 %v630_v53, 8 }
 0x55f   :  { %vm633_vm3 = vcmp.gt.s32.totalorder %v632_v47, 0  ;;  %v671_v21 = vand.u32 65535, %v1547_v12  ;;  %v672_v22 = vshrl.u32 %v1547_v12, 16 }
 0x560   :  { %v634_v49 = vsel %vm633_vm3, %v632_v47, 0 }
 0x561   :  { %v636_v50 = vand.u32 31, %v634_v49  ;;  %v1538_v54 = vshrl.u32 %v634_v49, 5 }
 0x562   :  { %v977_v51 = vpop.f32.mrf.mxu2 }
 0x563   :  { %v1536_v52 = vsub.s32 32, %v636_v50  ;;  %v639_v56 = vshll.u32 %v1379_v55, %v636_v50  ;;  %v642_v58 = vshll.u32 %v1380_v57, %v636_v50  ;;  %v645_v62 = vshll.u32 %v1381_v60, %v636_v50 }
 0x564   :  { %v648_v1 = vshll.u32 %v1382_v63, %v636_v50  ;;  %v651_v4 = vshll.u32 %v1383_v2, %v636_v50  ;;  %vm654_vm4 = vcmp.lt.s32.totalorder %v1538_v54, 1  ;;  %vm657_vm5 = vcmp.lt.s32.totalorder %v1538_v54, 4 }
 0x565   :  { %v640_v59 = vshrl.u32 %v1380_v57, %v1536_v52  ;;  %v643_v61 = vshrl.u32 %v1381_v60, %v1536_v52  ;;  %v646_v0 = vshrl.u32 %v1382_v63, %v1536_v52  ;;  %v649_v3 = vshrl.u32 %v1383_v2, %v1536_v52 }
 0x566   :  { %v652_v6 = vshrl.u32 %v1384_v5, %v1536_v52  ;;  %vm656_vm6 = vcmp.lt.s32.totalorder %v1538_v54, 3  ;;  %vm655_vm7 = vcmp.lt.s32.totalorder %v1538_v54, 2  ;;  %v638_v51 = vshrl.u32 %v1379_v55, %v1536_v52 }
 0x567   :  { %v641_v7 = vor.u32 %v640_v59, %v639_v56  ;;  %v644_v8 = vor.u32 %v643_v61, %v642_v58  ;;  %v647_v9 = vor.u32 %v646_v0, %v645_v62  ;;  %v650_v10 = vor.u32 %v649_v3, %v648_v1 }
 0x568   :  { %v653_v11 = vor.u32 %v652_v6, %v651_v4 }
 0x569   :  { %v662_v13 = vsel %vm654_vm4, %v641_v7, %v644_v8  ;;  %v666_v14 = vsel %vm654_vm4, %v644_v8, %v647_v9  ;;  %v663_v15 = vsel %vm657_vm5, %v650_v10, 920167782  ;;  %v659_v48 = vsel %vm657_vm5, %v647_v9, 2102212464 }
 0x56a   :  { %v667_v16 = vsel %vm657_vm5, %v653_v11, 1326507024  ;;  %v664_v17 = vsel %vm656_vm6, %v647_v9, %v663_v15  ;;  %v658_v60 = vsel %vm654_vm4, %v638_v51, %v641_v7  ;;  %v660_v61 = vsel %vm656_vm6, %v644_v8, %v659_v48 }
 0x56b   :  { %v668_v18 = vsel %vm656_vm6, %v650_v10, %v667_v16  ;;  %v665_v19 = vsel %vm655_vm7, %v662_v13, %v664_v17  ;;  %v661_v52 = vsel %vm655_vm7, %v658_v60, %v660_v61 }
 0x56c   :  { %v669_v20 = vsel %vm655_vm7, %v666_v14, %v668_v18  ;;  %v695_v25 = vand.u32 65535, %v665_v19  ;;  %v696_v26 = vshrl.u32 %v665_v19, 16  ;;  %v715_v5 = vmul.u32 %v1547_v12, %v661_v52 }
 0x56d   :  { %v673_v23 = vand.u32 65535, %v669_v20  ;;  %v674_v24 = vshrl.u32 %v669_v20, 16 }
 0x56e   :  { %v698_v29 = vmul.u32 %v696_v26, %v671_v21  ;;  %v699_v30 = vmul.u32 %v695_v25, %v672_v22  ;;  %v697_v34 = vmul.u32 %v695_v25, %v671_v21  ;;  %v700_v38 = vmul.u32 %v696_v26, %v672_v22 }
 0x56f   :  { %v676_v27 = vmul.u32 %v674_v24, %v671_v21  ;;  %v677_v28 = vmul.u32 %v673_v23, %v672_v22  ;;  %v675_v31 = vmul.u32 %v673_v23, %v671_v21  ;;  %v678_v33 = vmul.u32 %v674_v24, %v672_v22  ;;  %v933_v24 = vld [vmem:[%s1605_s9] sm:$0xf] }
 0x570   :  { %v701_v35 = vshll.u32 %v698_v29, 16  ;;  %v703_v42 = vshll.u32 %v699_v30, 16  ;;  %v702_v58 = vshrl.u32 %v698_v29, 16  ;;  %v704_v0 = vshrl.u32 %v699_v30, 16 }
 0x571   :  { %v679_v32 = vshll.u32 %v676_v27, 16  ;;  %v681_v36 = vshll.u32 %v677_v28, 16  ;;  %v680_v53 = vshrl.u32 %v676_v27, 16  ;;  %v682_v62 = vshrl.u32 %v677_v28, 16 }
 0x572   :  { %vm705_vm9 = vc.u32 %v697_v34, %v701_v35  ;;  %v707_v44 = vadd.s32 %v701_v35, %v697_v34  ;;  %v985_v25 = vsel %vm983_vm15, %v933_v24, 0 }
 0x573   :  { %vm683_vm8 = vc.u32 %v675_v31, %v679_v32  ;;  %v685_v37 = vadd.s32 %v679_v32, %v675_v31  ;;  %v706_v47 = vsel %vm705_vm9, 1, %v1385_v39  ;;  %994 = vmatpush.bf16.msra.mxu3 %v985_v25  ;;  %vm765_vm9 = vweird.f32 %v1528_v40 }
 0x574   :  { %v684_v41 = vsel %vm683_vm8, 1, %v1385_v39  ;;  %v708_v50 = vadd.s32 %v706_v47, %v700_v38  ;;  %vm709_vm11 = vc.u32 %v707_v44, %v703_v42  ;;  %v711_v3 = vadd.s32 %v707_v44, %v703_v42 }
 0x575   :  { %v686_v46 = vadd.s32 %v684_v41, %v678_v33  ;;  %vm687_vm10 = vc.u32 %v685_v37, %v681_v36  ;;  %v710_v57 = vsel %vm709_vm11, 1, %v1385_v39 }
 0x576   :  { %v688_v49 = vsel %vm687_vm10, 1, %v1385_v39  ;;  %v712_v59 = vadd.s32 %v710_v57, %v708_v50  ;;  %vm979_vm10 = vcmask 64512  }
 0x577   :  { %v690_v56 = vadd.s32 %v688_v49, %v686_v46  ;;  %v619_v49 = vlaneseq }
 0x578   :  { %v713_v1 = vadd.s32 %v712_v59, %v702_v58 }
 0x579   :  { %v691_v63 = vadd.s32 %v690_v56, %v680_v53  ;;  %v620_v58 = vand.u32 127, %v619_v49 }
 0x57a   :  { %v714_v55 = vadd.s32 %v713_v1, %v704_v0 }
 0x57b   :  { %v692_v2 = vadd.s32 %v691_v63, %v682_v62  ;;  %vm621_vm8 = vcmp.lt.s32.totalorder %v620_v58, 4 }
 0x57c   :  { %v718_v4 = vadd.s32 1, %v714_v55 }
 0x57d   :  { %vm717_vm12 = vc.u32 %v692_v2, %v711_v3  ;;  %v716_v54 = vadd.s32 %v711_v3, %v692_v2 }
 0x57e   :  { %v719_v6 = vsel %vm717_vm12, %v718_v4, %v714_v55 }
 0x57f   :  { %v720_v9 = vadd.s32 %v719_v6, %v715_v5  ;;  %v1271_v6 = vld [vmem:[%s1607_s11] ss:$0 sm:$0xff] }
 0x581   :  { %v721_v7 = vadd.s32 536870912, %v720_v9 }
 0x583   :  { %v722_v10 = vshrl.u32 %v721_v7, 30 }
 0x585   :  { %v723_v11 = vshll.u32 %v722_v10, 30  ;;  %v746_v32 = vsub.s32 4, %v722_v10 }
 0x587   :  { %v724_v8 = vsub.s32 %v720_v9, %v723_v11  ;;  %v747_v37 = vsel %vm624_vm0, %v746_v32, %v722_v10 }
 0x588   :  { %v749_v41 = vsel %vm623_vm1, 0, %v747_v37 }
 0x589   :  { %vm725_vm13 = vcmp.lt.s32.totalorder %v724_v8, 0  ;;  %v726_v13 = vsub.s32 0, %v724_v8  ;;  %v920_v48 = vadd.s32 3, %v749_v41  ;;  %v766_v56 = vand.u32 3, %v749_v41 }
 0x58b   :  { %v727_v14 = vsel %vm725_vm13, %v726_v13, %v724_v8  ;;  %v921_v57 = vand.u32 3, %v920_v48  ;;  %vm767_vm2 = vcmp.lt.s32.totalorder %v766_v56, 2  ;;  %vm768_vm3 = vcmp.eq.s32.totalorder %v766_v56, 0 }
 0x58c   :  { %v728_v15 = vclz %v727_v14  ;;  %vm771_vm4 = vcmp.eq.s32.totalorder %v766_v56, 2 }
 0x58d   :  { %vm922_vm5 = vcmp.lt.s32.totalorder %v921_v57, 2  ;;  %vm923_vm6 = vcmp.eq.s32.totalorder %v921_v57, 0  ;;  %vm926_vm7 = vcmp.eq.s32.totalorder %v921_v57, 2 }
 0x58e   :  { %v1185_v16 = vadd.s32 4294967294, %v728_v15 }
 0x590   :  { %vm1186_vm14 = vcmp.lt.s32.totalorder %v1185_v16, 0 }
 0x591   :  { %v731_v17 = vsel %vm1186_vm14, 0, %v1185_v16 }
 0x592   :  { %v732_v18 = vsub.s32 32, %v731_v17  ;;  %v736_v19 = vsub.s32 4294967266, %v731_v17  ;;  %v733_v20 = vshll.u32 %v724_v8, %v731_v17 }
 0x594   :  { %v734_v21 = vshrl.u32 %v716_v54, %v732_v18  ;;  %v737_v22 = vadd.s32 127, %v736_v19 }
 0x596   :  { %v735_v12 = vor.u32 %v734_v21, %v733_v20  ;;  %v738_v23 = vshll.u32 %v737_v22, 23 }
 0x598   :  { %v739_v26 = vor.u32 4788187, %v738_v23  ;;  %v742_v28 = vcvt.s32.f32 %v735_v12 }
 0x59a   :  { %v740_v27 = vand.u32 2147483647, %v739_v26 }
 0x59c   :  { %v743_v29 = vmul.f32 %v742_v28, %v740_v27 }
 0x59e   :  { %v744_v30 = vxor.u32 2147483648, %v743_v29 }
 0x5a0   :  { %v745_v31 = vsel %vm624_vm0, %v744_v30, %v743_v29 }
 0x5a1   :  { %v748_v33 = vsel %vm623_vm1, %v1528_v40, %v745_v31 }
 0x5a2   :  { %v750_v34 = vmul.f32 %v748_v33, %v748_v33 }
 0x5a4   :  { %v751_v35 = vmul.f32 -0.001358992, %v750_v34  ;;  %v758_v36 = vmul.f32 -0.00019511016, %v750_v34 }
 0x5a6   :  { %v752_v38 = vadd.f32 0.041655596, %v751_v35  ;;  %v759_v39 = vadd.f32 0.008332121, %v758_v36 }
 0x5a8   :  { %v753_v42 = vmul.f32 %v752_v38, %v750_v34  ;;  %v760_v44 = vmul.f32 %v759_v39, %v750_v34 }
 0x5aa   :  { %v754_v46 = vadd.f32 -0.4999988, %v753_v42  ;;  %v761_v47 = vadd.f32 -0.16666654, %v760_v44 }
 0x5ac   :  { %v755_v50 = vmul.f32 %v754_v46, %v750_v34  ;;  %v762_v51 = vmul.f32 %v761_v47, %v750_v34 }
 0x5ae   :  { %v756_v45 = vadd.f32 1.0, %v755_v50  ;;  %v763_v53 = vadd.f32 1.0, %v762_v51 }
 0x5b0   :  { %v764_v59 = vmul.f32 %v763_v53, %v748_v33  ;;  %v772_v60 = vxor.u32 2147483648, %v756_v45 }
 0x5b2   :  { %v769_v61 = vxor.u32 2147483648, %v764_v59  ;;  %v773_v63 = vsel %vm771_vm4, %v772_v60, %v764_v59  ;;  %v928_v1 = vsel %vm926_vm7, %v772_v60, %v764_v59 }
 0x5b4   :  { %v770_v62 = vsel %vm768_vm3, %v756_v45, %v769_v61  ;;  %v925_v0 = vsel %vm923_vm6, %v756_v45, %v769_v61 }
 0x5b5   :  { %v774_v2 = vsel %vm767_vm2, %v770_v62, %v773_v63  ;;  %v929_v3 = vsel %vm922_vm5, %v925_v0, %v928_v1 }
 0x5b6   :  { %v775_v52 = vsel %vm765_vm9, nan, %v774_v2  ;;  %v930_v55 = vsel %vm765_vm9, nan, %v929_v3 }
 0x5b7   :  { %v931_v4 = vsel %vm621_vm8, %v775_v52, %v930_v55 }
 0x5b8   :  { %v932_v5 = vpack.c.bf16 %v931_v4, %v931_v4 }
 0x5ba   :  { %1207 = vmatmul.msk.bf16.vlgmr.msra.gmra.mxu3 %vm979_vm10, %v932_v5 }
 0x63d   :  { %v996_v9 = vpop.f32.mrf.mxu3 }
 0x63e   :  { %v997_v40 = vadd.f32 %v996_v9, %v1531_v43 }
 0x640   :  { %v1004_v7 = vadd.f32 %v1271_v6, %v997_v40 }
 0x642   :  { %1005 = vst [vmem:[#allocation8] sm:$0xff] %v1004_v7 }
 0x643   :  { %1016 = dma.vmem_to_hbm [thread:$0]  %s1012_s29, 128, %s1014_s14, [#allocation4]  }
 0x645   :  { %v998_v10 = vpop.f32.mrf.mxu3 }
 0x646   :  { %1372 = dma.done.wait [#allocation4], 128  }
 0x647   :  { %1373 = vsyncadd [#allocation4], 4294967168 }
 0x648   :  { %1021 = vsyncpa [#allocation3], 1 }
 0x649   :  { %1022 = vsyncpa [#allocation6], 1 }
 0x64a   :  { %1023 = vsyncpa [#allocation4], 1 }

</bundles_post_ra>
